<compile_context>
chip_gen: v5e
topology: v5e:2x2
jax: 0.10.0
libtpu: 0.0.40
codegen_flags: <defaults>
</compile_context>

<pallas_src>
import functools
import math

import jax
import jax.numpy as jnp
from jax.experimental import pallas as pl
from jax.experimental.pallas import tpu as pltpu

_NEG_INF = -1e30  # finite "minus infinity": avoids inf-inf NaNs around masked tiles


def _round_up(x, m):
    return (x + m - 1) // m * m


def _pick_tile(S, cap=256):
    """Largest 8-aligned tile <= cap (the sequence is padded up to a multiple of it).

    Per-generation sweep guidance: v5e 128-256, v6e tq=256 / tkv=512, v7x 256 (64 MiB VMEM).
    """
    return min(_round_up(max(S, 8), 8), cap)


def _matmul_precision(dtype):
    # f32 operands: force the accurate MXU path (avoid silent bf16 demotion).
    # bf16 operands are already exact on the MXU with f32 accumulation.
    return jax.lax.Precision.HIGHEST if dtype == jnp.float32 else jax.lax.Precision.DEFAULT


# ---------------- pass 1: fused per-head Q/K/V projection (one shot) ----------------

def qkv_proj_kernel(x_ref, w_ref, q_ref, k_ref, v_ref, *, n_channel):
    C = n_channel
    prec = _matmul_precision(x_ref.dtype)
    qkv = jnp.dot(x_ref[0], w_ref[0], precision=prec,
                  preferred_element_type=jnp.float32)              # (tp, 3C)
    q_ref[0, 0] = qkv[:, :C].astype(q_ref.dtype)                   # 1/sqrt(C) folded in
    k_ref[0, 0] = qkv[:, C:2 * C].astype(k_ref.dtype)
    v_ref[0, 0] = qkv[:, 2 * C:].astype(v_ref.dtype)


# ---------------- pass 2: flash attention (online softmax over kv tiles) ----------------

def flash_attn_kernel(q_ref, k_ref, v_ref, ctx_ref, m_sc, l_sc, acc_sc,
                      *, seq_len, padded_len, tkv):
    ki = pl.program_id(2)

    @pl.when(ki == 0)
    def _init():
        m_sc[...] = jnp.full(m_sc.shape, _NEG_INF, jnp.float32)
        l_sc[...] = jnp.zeros(l_sc.shape, jnp.float32)
        acc_sc[...] = jnp.zeros(acc_sc.shape, jnp.float32)

    q = q_ref[0]                                                   # (H, tq, C)
    k = k_ref[0]                                                   # (H, tkv, C)
    v = v_ref[0]                                                   # (H, tkv, C)
    prec = _matmul_precision(q.dtype)

    # scores: the 1/sqrt(C) scale is already folded into the Q projection weights
    s = jnp.einsum('hqc,hkc->hqk', q, k, precision=prec,
                   preferred_element_type=jnp.float32)             # (H, tq, tkv)

    if padded_len != seq_len:  # static gate; only emitted when padding exists
        col = jax.lax.broadcasted_iota(jnp.int32, s.shape, 2) + ki * tkv
        s = jnp.where(col < seq_len, s, _NEG_INF)

    m_prev = m_sc[...]
    m_new = jnp.maximum(m_prev, jnp.max(s, axis=-1, keepdims=True))
    alpha = jnp.exp(m_prev - m_new)
    p = jnp.exp(s - m_new)                                         # f32
    l_sc[...] = alpha * l_sc[...] + jnp.sum(p, axis=-1, keepdims=True)
    acc_sc[...] = alpha * acc_sc[...] + jnp.einsum(
        'hqk,hkc->hqc', p.astype(v.dtype), v, precision=prec,
        preferred_element_type=jnp.float32)
    m_sc[...] = m_new

    @pl.when(ki == pl.num_programs(2) - 1)
    def _finalize():
        # exact normalization (the approx reciprocal caused the previous mismatch)
        ctx_ref[0] = (acc_sc[...] / l_sc[...]).astype(ctx_ref.dtype)


# ---------------- pass 3: output projection out = concat_h(ctx) @ Wo ----------------

def out_proj_kernel(ctx_ref, wo_ref, o_ref):
    H = ctx_ref.shape[1]
    prec = _matmul_precision(ctx_ref.dtype)
    acc = jnp.zeros(o_ref.shape[1:], jnp.float32)                  # (to, O)
    for h in range(H):                                             # static unroll
        acc = acc + jnp.dot(ctx_ref[0, h], wo_ref[h], precision=prec,
                            preferred_element_type=jnp.float32)
    # activation = identity (module default); dropout = eval-mode identity
    o_ref[0] = acc.astype(o_ref.dtype)


# ---------------- wrapper ----------------

def mha_forward(x, Wq, Wk, Wv, Wo, *, tq=None, tkv=None, compute_dtype=jnp.float32):
    B, S, D = x.shape
    H, _, C = Wq.shape
    O = Wo.shape[-1]
    scale = 1.0 / math.sqrt(float(C))          # Python float; no device round-trip

    # Fused per-head projection weights (H, D, 3C): [Wq * 1/sqrt(C) | Wk | Wv].
    w_qkv = jnp.concatenate([Wq * scale, Wk, Wv], axis=-1).astype(compute_dtype)
    # Wo rows are head-major (h*C + c), matching torch concat(unbind(ctx, 1), -1).
    wo_h = Wo.reshape(H, C, O).astype(compute_dtype)

    if tq is None:
        tq = _pick_tile(S)
    if tkv is None:
        tkv = _pick_tile(S)
    assert tq % 8 == 0 and tkv % 8 == 0, "tiles must be multiples of 8"

    s_pad = _round_up(S, math.lcm(tq, tkv))
    x_p = x.astype(compute_dtype)
    if s_pad != S:
        x_p = jnp.pad(x_p, ((0, 0), (0, s_pad - S), (0, 0)))

    # ---- pass 1: Q/K/V projections, computed once per token (not per q tile) ----
    q, k, v = pl.pallas_call(
        functools.partial(qkv_proj_kernel, n_channel=C),
        out_shape=[jax.ShapeDtypeStruct((B, H, s_pad, C), compute_dtype)] * 3,
        grid_spec=pltpu.PrefetchScalarGridSpec(
            num_scalar_prefetch=0,
            grid=(B, H, s_pad // tq),
            in_specs=[
                pl.BlockSpec((1, tq, D), lambda b, h, si: (b, si, 0)),
                pl.BlockSpec((1, D, 3 * C), lambda b, h, si: (h, 0, 0)),
            ],
            out_specs=[
                pl.BlockSpec((1, 1, tq, C), lambda b, h, si: (b, h, si, 0)),
                pl.BlockSpec((1, 1, tq, C), lambda b, h, si: (b, h, si, 0)),
                pl.BlockSpec((1, 1, tq, C), lambda b, h, si: (b, h, si, 0)),
            ],
        ),
        compiler_params=pltpu.CompilerParams(
            dimension_semantics=("parallel", "parallel", "parallel")),
    )(x_p, w_qkv)

    # ---- pass 2: flash attention (no weight operands in this kernel) ----
    ctx = pl.pallas_call(
        functools.partial(flash_attn_kernel, seq_len=S, padded_len=s_pad, tkv=tkv),
        out_shape=jax.ShapeDtypeStruct((B, H, s_pad, C), compute_dtype),
        grid_spec=pltpu.PrefetchScalarGridSpec(
            num_scalar_prefetch=0,
            grid=(B, s_pad // tq, s_pad // tkv),
            in_specs=[
                pl.BlockSpec((1, H, tq, C), lambda b, qi, ki: (b, 0, qi, 0)),
                pl.BlockSpec((1, H, tkv, C), lambda b, qi, ki: (b, 0, ki, 0)),
                pl.BlockSpec((1, H, tkv, C), lambda b, qi, ki: (b, 0, ki, 0)),
            ],
            out_specs=pl.BlockSpec((1, H, tq, C), lambda b, qi, ki: (b, 0, qi, 0)),
            scratch_shapes=[
                pltpu.VMEM((H, tq, 1), jnp.float32),   # running max m
                pltpu.VMEM((H, tq, 1), jnp.float32),   # running denom l
                pltpu.VMEM((H, tq, C), jnp.float32),   # unnormalized context
            ],
        ),
        compiler_params=pltpu.CompilerParams(
            dimension_semantics=("parallel", "parallel", "arbitrary"),
            vmem_limit_bytes=48 * 1024 * 1024,   # leave headroom on v7x (64 MiB physical)
        ),
    )(q, k, v)

    # ---- pass 3: output projection (hoisted out of the flash kernel) ----
    out = pl.pallas_call(
        out_proj_kernel,
        out_shape=jax.ShapeDtypeStruct((B, s_pad, O), jnp.float32),
        grid_spec=pltpu.PrefetchScalarGridSpec(
            num_scalar_prefetch=0,
            grid=(B, s_pad // tq),
            in_specs=[
                pl.BlockSpec((1, H, tq, C), lambda b, si: (b, 0, si, 0)),
                pl.BlockSpec((H, C, O), lambda b, si: (0, 0, 0)),
            ],
            out_specs=pl.BlockSpec((1, tq, O), lambda b, si: (b, si, 0)),
        ),
        compiler_params=pltpu.CompilerParams(
            dimension_semantics=("parallel", "parallel")),
    )(ctx, wo_h)

    return out[:, :S, :] if s_pad != S else out


def mha_reference(x, Wq, Wk, Wv, Wo):
    # pure-JAX reference mirroring the PyTorch forward (eval mode)
    q = jnp.einsum('bsd,hdc->bhsc', x, Wq)
    k = jnp.einsum('bsd,hdc->bhsc', x, Wk)
    v = jnp.einsum('bsd,hdc->bhsc', x, Wv)
    C = Wq.shape[-1]
    att = jax.nn.softmax(
        jnp.einsum('bhsc,bhtc->bhst', q, k) / jnp.sqrt(jnp.float32(C)), axis=-1)
    ctx = jnp.einsum('bhst,bhtc->bhsc', att, v)            # (B, H, S, C)
    B, H, S, Cc = ctx.shape
    vc = jnp.transpose(ctx, (0, 2, 1, 3)).reshape(B, S, H * Cc)
    return vc @ Wo


if __name__ == "__main__":
    # small shapes consistent with the module
    B, S = 2, 16
    n_head, n_dim, n_channel, n_out = 2, 8, 4, 8

    key = jax.random.PRNGKey(0)
    kx, kq, kk, kv_, ko = jax.random.split(key, 5)
    x = jax.random.normal(kx, (B, S, n_dim), dtype=jnp.float32)
    Wq = jax.random.normal(kq, (n_head, n_dim, n_channel), dtype=jnp.float32)
    Wk = jax.random.normal(kk, (n_head, n_dim, n_channel), dtype=jnp.float32)
    Wv = jax.random.normal(kv_, (n_head, n_dim, n_channel), dtype=jnp.float32)
    Wo = jax.random.normal(ko, (n_head * n_channel, n_out), dtype=jnp.float32)

    ref = mha_reference(x, Wq, Wk, Wv, Wo)

    # 1) single-tile path (tq = tkv = S), f32
    out1 = jax.block_until_ready(mha_forward(x, Wq, Wk, Wv, Wo))
    assert out1.shape == (B, S, n_out)
    assert jnp.allclose(out1, ref, atol=5e-3, rtol=5e-3), "single-tile mismatch vs reference"

    # 2) multi-tile path exercising the online-softmax kv loop (grid = (2, 2, 2))
    out2 = jax.block_until_ready(mha_forward(x, Wq, Wk, Wv, Wo, tq=8, tkv=8))
    assert jnp.allclose(out2, ref, atol=5e-3, rtol=5e-3), "multi-tile mismatch vs reference"

    # 3) padded / masked path: S = 12 is not a multiple of the 8-wide tiles
    S2 = 12
    x2 = x[:, :S2, :]
    ref2 = mha_reference(x2, Wq, Wk, Wv, Wo)
    out3 = jax.block_until_ready(mha_forward(x2, Wq, Wk, Wv, Wo, tq=8, tkv=8))
    assert out3.shape == (B, S2, n_out)
    assert jnp.allclose(out3, ref2, atol=5e-3, rtol=5e-3), "padded-path mismatch vs reference"

    # 4) bf16 MXU path (f32 accumulation) — coarse sanity check of the low-precision path
    out4 = jax.block_until_ready(
        mha_forward(x, Wq, Wk, Wv, Wo, tq=8, tkv=8, compute_dtype=jnp.bfloat16))
    assert out4.shape == (B, S, n_out)
    assert bool(jnp.isfinite(out4).all())
    rel = jnp.linalg.norm(out4 - ref) / jnp.linalg.norm(ref)
    assert float(rel) < 0.1, f"bf16 path too far from reference: rel={float(rel)}"

    print("KERNEL_OK")
</pallas_src>

<mosaic_0001>
module attributes {stable_mosaic.version = 11 : i64} {
  func.func @qkv_proj_kernel(%arg0: i32, %arg1: i32, %arg2: i32, %arg3: memref<1x16x8xf32, #tpu.memory_space<vmem>>, %arg4: memref<1x8x12xf32, #tpu.memory_space<vmem>>, %arg5: memref<1x1x16x4xf32, #tpu.memory_space<vmem>>, %arg6: memref<1x1x16x4xf32, #tpu.memory_space<vmem>>, %arg7: memref<1x1x16x4xf32, #tpu.memory_space<vmem>>) attributes {dimension_semantics = [#tpu.dimension_semantics<parallel>, #tpu.dimension_semantics<parallel>, #tpu.dimension_semantics<parallel>], iteration_bounds = array<i64: 2, 2, 1>, scalar_prefetch = 0 : i64, scratch_operands = 0 : i64, tpu.core_type = #tpu.core_type<tc>, window_params = [{transform_indices = @transform_0, window_bounds = array<i64: 1, 16, 8>}, {transform_indices = @transform_1, window_bounds = array<i64: 1, 8, 12>}, {transform_indices = @transform_2, window_bounds = array<i64: 1, 1, 16, 4>}, {transform_indices = @transform_3, window_bounds = array<i64: 1, 1, 16, 4>}, {transform_indices = @transform_4, window_bounds = array<i64: 1, 1, 16, 4>}]} {
    %c0 = arith.constant 0 : index
    %c0_0 = arith.constant 0 : index
    %c0_1 = arith.constant 0 : index
    %0 = vector.load %arg3[%c0, %c0_0, %c0_1] : memref<1x16x8xf32, #tpu.memory_space<vmem>>, vector<1x16x8xf32>
    %1 = vector.shape_cast %0 : vector<1x16x8xf32> to vector<16x8xf32>
    %c0_2 = arith.constant 0 : index
    %c0_3 = arith.constant 0 : index
    %c0_4 = arith.constant 0 : index
    %2 = vector.load %arg4[%c0_2, %c0_3, %c0_4] : memref<1x8x12xf32, #tpu.memory_space<vmem>>, vector<1x8x12xf32>
    %3 = vector.shape_cast %2 : vector<1x8x12xf32> to vector<8x12xf32>
    %cst = arith.constant dense<0.000000e+00> : vector<16x12xf32>
    %4 = tpu.matmul %1, %3, %cst {dimension_numbers = #tpu.dot_dimension_numbers<[1], [0], [0], [1], [0, 0, 1, 1], [], []>, precision = #tpu.contract_precision<fp32>} : vector<16x8xf32>, vector<8x12xf32>, vector<16x12xf32> -> vector<16x12xf32>
    %5 = vector.extract_strided_slice %4 {offsets = [0, 0], sizes = [16, 4], strides = [1, 1]} : vector<16x12xf32> to vector<16x4xf32>
    %c0_5 = arith.constant 0 : index
    %c0_6 = arith.constant 0 : index
    %c0_7 = arith.constant 0 : index
    %c0_8 = arith.constant 0 : index
    %6 = vector.load %arg5[%c0_5, %c0_6, %c0_7, %c0_8] : memref<1x1x16x4xf32, #tpu.memory_space<vmem>>, vector<1x1x16x4xf32>
    %7 = vector.shape_cast %6 : vector<1x1x16x4xf32> to vector<16x4xf32>
    %8 = vector.shape_cast %5 : vector<16x4xf32> to vector<1x1x16x4xf32>
    tpu.vector_store %arg5[%c0_5, %c0_6, %c0_7, %c0_8], %8 {strides = array<i32>} : memref<1x1x16x4xf32, #tpu.memory_space<vmem>>, vector<1x1x16x4xf32>,
    %9 = vector.extract_strided_slice %4 {offsets = [0, 4], sizes = [16, 4], strides = [1, 1]} : vector<16x12xf32> to vector<16x4xf32>
    %c0_9 = arith.constant 0 : index
    %c0_10 = arith.constant 0 : index
    %c0_11 = arith.constant 0 : index
    %c0_12 = arith.constant 0 : index
    %10 = vector.load %arg6[%c0_9, %c0_10, %c0_11, %c0_12] : memref<1x1x16x4xf32, #tpu.memory_space<vmem>>, vector<1x1x16x4xf32>
    %11 = vector.shape_cast %10 : vector<1x1x16x4xf32> to vector<16x4xf32>
    %12 = vector.shape_cast %9 : vector<16x4xf32> to vector<1x1x16x4xf32>
    tpu.vector_store %arg6[%c0_9, %c0_10, %c0_11, %c0_12], %12 {strides = array<i32>} : memref<1x1x16x4xf32, #tpu.memory_space<vmem>>, vector<1x1x16x4xf32>,
    %13 = vector.extract_strided_slice %4 {offsets = [0, 8], sizes = [16, 4], strides = [1, 1]} : vector<16x12xf32> to vector<16x4xf32>
    %c0_13 = arith.constant 0 : index
    %c0_14 = arith.constant 0 : index
    %c0_15 = arith.constant 0 : index
    %c0_16 = arith.constant 0 : index
    %14 = vector.load %arg7[%c0_13, %c0_14, %c0_15, %c0_16] : memref<1x1x16x4xf32, #tpu.memory_space<vmem>>, vector<1x1x16x4xf32>
    %15 = vector.shape_cast %14 : vector<1x1x16x4xf32> to vector<16x4xf32>
    %16 = vector.shape_cast %13 : vector<16x4xf32> to vector<1x1x16x4xf32>
    tpu.vector_store %arg7[%c0_13, %c0_14, %c0_15, %c0_16], %16 {strides = array<i32>} : memref<1x1x16x4xf32, #tpu.memory_space<vmem>>, vector<1x1x16x4xf32>,
    return
  }
  func.func @transform_0(%arg0: i32, %arg1: i32, %arg2: i32) -> (i32, i32, i32) {
    %c0_i32 = arith.constant 0 : i32
    %c0_i32_0 = arith.constant 0 : i32
    return %arg0, %arg2, %c0_i32 : i32, i32, i32
  }
  func.func @transform_1(%arg0: i32, %arg1: i32, %arg2: i32) -> (i32, i32, i32) {
    %c0_i32 = arith.constant 0 : i32
    %c0_i32_0 = arith.constant 0 : i32
    %c0_i32_1 = arith.constant 0 : i32
    return %arg1, %c0_i32, %c0_i32_0 : i32, i32, i32
  }
  func.func @transform_2(%arg0: i32, %arg1: i32, %arg2: i32) -> (i32, i32, i32, i32) {
    %c0_i32 = arith.constant 0 : i32
    %c0_i32_0 = arith.constant 0 : i32
    return %arg0, %arg1, %arg2, %c0_i32 : i32, i32, i32, i32
  }
  func.func @transform_3(%arg0: i32, %arg1: i32, %arg2: i32) -> (i32, i32, i32, i32) {
    %c0_i32 = arith.constant 0 : i32
    %c0_i32_0 = arith.constant 0 : i32
    return %arg0, %arg1, %arg2, %c0_i32 : i32, i32, i32, i32
  }
  func.func @transform_4(%arg0: i32, %arg1: i32, %arg2: i32) -> (i32, i32, i32, i32) {
    %c0_i32 = arith.constant 0 : i32
    %c0_i32_0 = arith.constant 0 : i32
    return %arg0, %arg1, %arg2, %c0_i32 : i32, i32, i32, i32
  }
}

</mosaic_0001>

<bundles_post_ra>
// kernel: tpu_custom_call.1
= control target key start
LH: loop header
LB: loop body
LE: loop exit
PB: predicated region body
PF: predicated region fallthrough
CT: control target
= control target key end

     0   :  { %s930_s15 = smov 0   ;;  %s932_s16 = smov 0   ;;  %s1004_s0 = inlined_call_operand.vmem [shape: f32[2,16,8], index: 0, kind: input, shape index: {}]   ;;  %s1005_s1 = inlined_call_operand.vmem [shape: f32[2,8,12], index: 1, kind: input, shape index: {}]   ;;  %s1006_s2 = inlined_call_operand.vmem [shape: f32[2,2,16,4], index: 2, kind: output, shape index: {0}]   ;;  %s1007_s3 = inlined_call_operand.vmem [shape: f32[2,2,16,4], index: 3, kind: output, shape index: {1}]   ;;  %s1008_s4 = inlined_call_operand.vmem [shape: f32[2,2,16,4], index: 4, kind: output, shape index: {2}]  }
   0x1   :  { %s934_s17 = smov 0   ;;  %s936_s18 = smov 0  }
   0x2   :  { %s938_s19 = smov 0  }
   0x3 LB: > { %s30_s20 = sadd.s32 1, %s893_s17  ;;  %s34_s21 = sadd.s32 1, %s897_s18  ;;  %s901_s19 = sphi %s938_s19, %s15_s19   ;;  %s897_s18 = sphi %s936_s18, %s1012_s18   ;;  %s893_s17 = sphi %s934_s17, %s1011_s17   ;;  %s889_s16 = sphi %s932_s16, %s1010_s16   ;;  %s885_s15 = sphi %s930_s15, %s1009_s15  }
   0x4   : > { %p32_p0 = scmp.ge.s32.totalorder %s30_s20, 2  ;;  %p803_p1 = scmp.ge.s32.totalorder %s901_s19, 1 }
   0x5   : > { %p214_p2 = scmp.lt.s32.totalorder %s901_s19, 5 }
   0x6   : > { %s1014_s20 = smov (%p32_p0, %s30_s20), 0  ;;  %s1016_s21 = smov (!%p32_p0, %s34_s21), %s897_s18 }
   0x7   : > { %p215_p3 = pnand %p803_p1, %p214_p2  ;;  %p36_p4 = scmp.ge.s32.totalorder %s1016_s21, 2 }
   0x8   : > { %p292_p5 = scmp.lt.s32.totalorder (!%p215_p3), %s885_s15, 1  ;;  %p283_p6 = scmp.lt.s32.totalorder (!%p215_p3), %s889_s16, 1 }
   0x9   : > { %s1018_s21 = smov (%p36_p4, %s1016_s21), 0  ;;  %218 = sbr.rel (%p215_p3) target bundleno = 303 (0x12f), region = 28 }
   0xa   : > { %s903_s11 = smov (!%p215_p3), 120   ;;  %s904_s12 = smov (!%p215_p3), 124  }
   0xe   : > { %s1020_s15 = smov (!%p292_p5, %s885_s15), 1  ;;  %s1022_s16 = smov (!%p283_p6, %s889_s16), 1  ;;  %vm341_vm0 = vcmask 64512   ;;  %vm525_vm1 = vcmask 31744  }
   0xf   : > { %s806_s22 = sshll.u32 %s1020_s15, 3  ;;  %s818_s26 = sshll.u32 %s1022_s16, 4 }
  0x10   : > { %s295_s25 = scalar_lea.vmem %s1005_s1, %s806_s22  ;;  %s290_s29 = scalar_lea.vmem %s1004_s0, %s818_s26 }
  0x11   : > { %v340_v0 = vld [vmem:[%s295_s25] sm:$0xff]  ;;  %v339_v2 = vld [vmem:[%s290_s29 + $0x8] sm:$0xff]  ;;  %s807_s30 = sshll.u32 %s1020_s15, 1  ;;  %s808_s5 = sshll.u32 %s1022_s16, 2 }
  0x12   : > { %v363_v1 = vand.u32 4294901760, %v340_v0  ;;  %v338_v3 = vld [vmem:[%s290_s29] sm:$0xff]  ;;  %v346_v4 = vsel %vm341_vm0, %v339_v2, 0  ;;  %s306_s6 = sadd.s32 %s808_s5, %s807_s30 }
  0x13   : > { %v343_v5 = vsel %vm341_vm0, %v338_v3, 0  ;;  %v373_v7 = vand.u32 4294901760, %v346_v4  ;;  %s809_s7 = sshll.u32 %s306_s6, 3 }
  0x14   : > { %819 = vmatpush.msra.mxu2 %v363_v1  ;;  %v398_v6 = vsub.f32 %v340_v0, %v363_v1  ;;  %v365_v8 = vand.u32 4294901760, %v343_v5  ;;  %364 = vmatpush.msra.mxu0 %v363_v1  ;;  %s308_s10 = scalar_lea.vmem %s1006_s2, %s809_s7  ;;  %s336_s15 = scalar_lea.vmem %s1008_s4, %s809_s7 }
  0x15   : > { %v374_v10 = vsub.f32 %v346_v4, %v373_v7  ;;  %s322_s23 = scalar_lea.vmem %s1007_s3, %s809_s7 }
  0x16   : > { %v399_v9 = vand.u32 4294901760, %v398_v6  ;;  %429 = vmatpush.msrb.mxu2 %v398_v6  ;;  %v366_v11 = vsub.f32 %v343_v5, %v365_v8 }
  0x17   : > { %v375_v13 = vand.u32 4294901760, %v374_v10 }
  0x18   : > { %v400_v12 = vsub.f32 %v398_v6, %v399_v9  ;;  %v367_v14 = vand.u32 4294901760, %v366_v11  ;;  %489 = vmatpush.msrb.mxu0 %v399_v9 }
  0x19   : > { %v376_v16 = vsub.f32 %v374_v10, %v375_v13 }
  0x1a   : > { %v401_v15 = vand.u32 4294901760, %v400_v12  ;;  %v368_v17 = vsub.f32 %v366_v11, %v367_v14 }
  0x1b   : > { %v377_v18 = vand.u32 4294901760, %v376_v16 }
  0x1c   : > { %820 = vmatpush.msra.mxu3 %v401_v15  ;;  %402 = vmatpush.msra.mxu1 %v401_v15  ;;  %v369_v19 = vand.u32 4294901760, %v368_v17 }
  0x1d   : > { %408 = vmatmul.f32.vlgmr.msra.gmra.mxu3 %v373_v7  ;;  %404 = vmatmul.f32.vlgmr.msra.gmra.mxu1 %v365_v8 }
  0x1e   : > { %378 = vmatmul.f32.vlgmr.msra.gmra.mxu2 %v377_v18  ;;  %457 = vmatpush.msrb.mxu3 %v363_v1 }
  0x1f   : > { %370 = vmatmul.f32.vlgmr.msra.gmra.mxu0 %v369_v19  ;;  %515 = vmatpush.msrb.mxu1 %v363_v1 }
  0x25   : > { %461 = vmatmul.f32.vlgmr.msrb.gmra.mxu3 %v367_v14  ;;  %517 = vmatmul.f32.vlgmr.msrb.gmra.mxu1 %v365_v8 }
  0x26   : > { %432 = vmatmul.f32.vlgmr.msrb.gmra.mxu2 %v366_v11 }
  0x27   : > { %491 = vmatmul.f32.vlgmr.msrb.gmra.mxu0 %v365_v8 }
  0x2d   : > { %467 = vmatmul.f32.gmra.mxu3 %v375_v13  ;;  %521 = vmatmul.f32.gmra.mxu1 %v373_v7 }
  0x2e   : > { %437 = vmatmul.f32.gmra.mxu2 %v374_v10 }
  0x2f   : > { %495 = vmatmul.f32.gmra.mxu0 %v373_v7 }
  0x9a   : > { %v405_v23 = vpop.f32.mrf.mxu1 }
  0x9c   : > { %v371_v20 = vpop.f32.mrf.mxu0 }
  0x9d   : > { %v406_v24 = vadd.f32 %v405_v23, %v371_v20 }
  0xa0   : > { %v409_v21 = vpop.f32.mrf.mxu3 }
  0xa1   : > { %v379_v22 = vpop.f32.mrf.mxu2 }
  0xa2   : > { %v518_v29 = vpop.f32.mrf.mxu1  ;;  %v410_v32 = vadd.f32 %v409_v21, %v379_v22 }
  0xa4   : > { %v492_v27 = vpop.f32.mrf.mxu0 }
  0xa8   : > { %v462_v25 = vpop.f32.mrf.mxu3 }
  0xa9   : > { %v433_v26 = vpop.f32.mrf.mxu2 }
  0xaa   : > { %v434_v28 = vadd.f32 %v433_v26, %v406_v24  ;;  %v522_v39 = vpop.f32.mrf.mxu1 }
  0xac   : > { %v463_v30 = vadd.f32 %v462_v25, %v434_v28  ;;  %v496_v37 = vpop.f32.mrf.mxu0 }
  0xae   : > { %v493_v31 = vadd.f32 %v492_v27, %v463_v30 }
  0xb0   : > { %v519_v33 = vadd.f32 %v518_v29, %v493_v31  ;;  %v468_v35 = vpop.f32.mrf.mxu3 }
  0xb1   : > { %v438_v34 = vpop.f32.mrf.mxu2 }
  0xb2   : > { %526 = vst.msk [vmem:[%s308_s10] sm:$0xff] %vm525_vm1, %v519_v33  ;;  %v439_v36 = vadd.f32 %v438_v34, %v410_v32  ;;  %538 = vrot.lane.b32.xlu1 %v519_v33, %s903_s11  ;;  %530 = vrot.lane.b32.xlu0 %v519_v33, %s904_s12 }
  0xb4   : > { %v469_v38 = vadd.f32 %v468_v35, %v439_v36 }
  0xb6   : > { %v497_v40 = vadd.f32 %v496_v37, %v469_v38 }
  0xb8   : > { %v523_v41 = vadd.f32 %v522_v39, %v497_v40 }
  0xba   : > { %527 = vst.msk [vmem:[%s308_s10 + $0x8] sm:$0xff] %vm525_vm1, %v523_v41  ;;  %540 = vrot.lane.b32.xlu1 %v523_v41, %s903_s11  ;;  %532 = vrot.lane.b32.xlu0 %v523_v41, %s904_s12 }
 0x124   : > { %v539_v42 = vpop.permute.xlu1 %538  ;;  %v531_v43 = vpop.permute.xlu0 %530 }
 0x125   : > { %544 = vst.msk [vmem:[%s336_s15] sm:$0xff] %vm525_vm1, %v539_v42 }
 0x126   : > { %536 = vst.msk [vmem:[%s322_s23] sm:$0xff] %vm525_vm1, %v531_v43 }
 0x12c   : > { %v541_v44 = vpop.permute.xlu1 %540  ;;  %v533_v45 = vpop.permute.xlu0 %532 }
 0x12d   : > { %545 = vst.msk [vmem:[%s336_s15 + $0x8] sm:$0xff] %vm525_vm1, %v541_v44 }
 0x12e   : > { %537 = vst.msk [vmem:[%s322_s23 + $0x8] sm:$0xff] %vm525_vm1, %v533_v45 }
 0x12f PF: > { %s15_s19 = sadd.s32 1, %s901_s19   ;;  %s1009_s15 = smov %s893_s17 }
 0x130   : > { %p12_p7 = scmp.ge.s32.totalorder %s15_s19, 6   ;;  %s1010_s16 = smov %s897_s18 }
 0x131   : > { %s1011_s17 = smov %s1014_s20  ;;  %s1012_s18 = smov %s1018_s21 }
 0x132   :  { %14 = sbr.rel (!%p12_p7) target bundleno = 3 (0x3), region = 85 }

</bundles_post_ra>
